<compile_context>
chip_gen: v7x
topology: tpu7x:2x2x1
jax: 0.10.0
libtpu: 0.0.40
codegen_flags: <defaults>
</compile_context>

<pallas_src>
import functools

import jax
import jax.numpy as jnp
from jax import lax
from jax.experimental import pallas as pl
from jax.experimental.pallas import tpu as pltpu


def _round_up(x, m):
    return (x + m - 1) // m * m


def _choose_tile(c, hw, logit_bytes, target_bytes, max_tile=None):
    """Pick the pixel tile (lane axis) and report the per-step VMEM footprint."""
    budget = 22 * 1024 * 1024          # v7x-safe per-step footprint budget
    target_step_bytes = 2 * 1024 * 1024  # ~2 MiB of logits per grid step
    c_pad = _round_up(c, 8)            # sublane padding for footprint accounting

    def footprint(t):
        return (2 * c_pad * t * logit_bytes     # double-buffered logits
                + 2 * 8 * t * target_bytes      # double-buffered targets
                + 2 * c_pad * t * 4)            # two f32 accumulators

    cap = max(128, target_step_bytes // max(1, logit_bytes * c))
    cap = min(cap, 64 * 1024)
    if max_tile is not None:
        cap = min(cap, max(128, int(max_tile)))
    cap = max(128, (cap // 128) * 128)
    while cap > 128 and footprint(cap) > budget:
        cap -= 128
    if hw <= cap:
        # Single full-extent block: no ragged tail, no masking needed.
        return hw, footprint(hw)
    return cap, footprint(cap)


def _make_dice_kernel(c, tile, hw, steps_per_split, need_mask):
    def kernel(x_ref, t_ref, inter_ref, psum_ref, inter_acc, psum_acc):
        # x_ref:     (1, C, TILE)  logits, native dtype (classes on sublanes)
        # t_ref:     (1, 1, TILE)  integer targets, native dtype
        # inter_ref: (1, 1, C, 1)  per-(split, batch) intersection output
        # psum_ref:  (1, 1, C, 1)  per-(split, batch) softmax-mass output
        # *_acc:     (C, TILE)     f32 VMEM elementwise accumulators
        p_id = pl.program_id(0)
        j = pl.program_id(2)

        @pl.when(j == 0)
        def _init():
            inter_acc[...] = jnp.zeros_like(inter_acc)
            psum_acc[...] = jnp.zeros_like(psum_acc)

        x = x_ref[0].astype(jnp.float32)     # (C, TILE)
        t = t_ref[0].astype(jnp.int32)       # (1, TILE)

        # Numerically stable softmax over the class (sublane) axis.
        m = jnp.max(x, axis=0, keepdims=True)            # (1, TILE)
        e = jnp.exp(x - m)                                # (C, TILE)  EUP
        s = jnp.sum(e, axis=0, keepdims=True)             # (1, TILE)
        r = pl.reciprocal(s, approx=True)                 # EUP vrcp
        r = r * (2.0 - s * r)                             # one NR refinement
        prob = e * r                                      # (C, TILE)

        cls = lax.broadcasted_iota(jnp.int32, (c, 1), 0)  # (C, 1)
        hit = cls == t                                    # (C, TILE) via broadcast

        if need_mask:
            blk = p_id * steps_per_split + j              # logical pixel-block index
            pix0 = blk * tile

            @pl.when(pix0 + tile <= hw)                   # fully in-range tile
            def _full():
                inter_acc[...] += jnp.where(hit, prob, 0.0)
                psum_acc[...] += prob

            @pl.when(pix0 + tile > hw)                    # ragged / out-of-range tile
            def _ragged():
                lane = lax.broadcasted_iota(jnp.int32, (1, tile), 1)
                valid = (pix0 + lane) < hw
                inter_acc[...] += jnp.where(jnp.logical_and(hit, valid), prob, 0.0)
                psum_acc[...] += jnp.where(valid, prob, 0.0)
        else:
            inter_acc[...] += jnp.where(hit, prob, 0.0)
            psum_acc[...] += prob

        @pl.when(j == pl.num_programs(2) - 1)
        def _finalize():
            inter_ref[...] = jnp.sum(inter_acc[...], axis=1,
                                     keepdims=True).reshape(1, 1, c, 1)
            psum_ref[...] = jnp.sum(psum_acc[...], axis=1,
                                    keepdims=True).reshape(1, 1, c, 1)

    return kernel


@functools.partial(jax.jit, static_argnames=("max_tile",))
def dice_loss(logits_nchw, targets_nhw, max_tile=None):
    """Soft dice loss matching the PyTorch DiceLoss.forward (mean over classes)."""
    n, c, h, w = logits_nchw.shape
    hw = h * w

    # Native layout & dtype: classes on sublanes, pixels on lanes; reshapes are free.
    x = logits_nchw.reshape(n, c, hw)
    t = targets_nhw.reshape(n, 1, hw)

    logit_bytes = jnp.dtype(x.dtype).itemsize
    target_bytes = jnp.dtype(t.dtype).itemsize
    tile, fp = _choose_tile(c, hw, logit_bytes, target_bytes, max_tile)

    nblk = -(-hw // tile)                       # logical pixel blocks
    nsplit = 2 if nblk >= 2 else 1              # pixel-split parallel axis (v7x)
    spc = -(-nblk // nsplit)                    # steps per split
    need_mask = (nsplit * spc * tile != hw)     # any ragged / out-of-range block?

    def in_map(p, i, j):
        # Clamp so the DMA stays in bounds; out-of-range logical blocks are
        # masked to zero contribution inside the kernel.
        return (i, 0, jnp.minimum(p * spc + j, nblk - 1))

    vmem_limit = int(min(30 * 1024 * 1024, max(16 * 1024 * 1024, fp + 6 * 1024 * 1024)))

    kernel = _make_dice_kernel(c, tile, hw, spc, need_mask)

    inter_p, psum_p = pl.pallas_call(
        kernel,
        out_shape=(
            jax.ShapeDtypeStruct((nsplit, n, c, 1), jnp.float32),
            jax.ShapeDtypeStruct((nsplit, n, c, 1), jnp.float32),
        ),
        grid_spec=pltpu.PrefetchScalarGridSpec(
            num_scalar_prefetch=0,
            grid=(nsplit, n, spc),
            in_specs=[
                pl.BlockSpec((1, c, tile), in_map),
                pl.BlockSpec((1, 1, tile), in_map),
            ],
            out_specs=[
                pl.BlockSpec((1, 1, c, 1), lambda p, i, j: (p, i, 0, 0)),
                pl.BlockSpec((1, 1, c, 1), lambda p, i, j: (p, i, 0, 0)),
            ],
            scratch_shapes=[
                pltpu.VMEM((c, tile), jnp.float32),
                pltpu.VMEM((c, tile), jnp.float32),
            ],
        ),
        compiler_params=pltpu.CompilerParams(
            dimension_semantics=("parallel", "parallel", "arbitrary"),
            vmem_limit_bytes=vmem_limit,
        ),
    )(x, t)

    # O(C) glue: sum partial stats over (split, batch); per-class target counts
    # are just a label histogram (the dropped tsum accumulator).
    inter = jnp.sum(inter_p, axis=(0, 1))[:, 0]            # (C,)
    psum = jnp.sum(psum_p, axis=(0, 1))[:, 0]              # (C,)
    tsum = jnp.zeros((c,), jnp.float32).at[targets_nhw.reshape(-1)].add(1.0)

    smooth = 1e-5
    dice_per_class = 1.0 - (2.0 * inter + smooth) / (psum + tsum + smooth)
    return jnp.mean(dice_per_class)


def _reference_dice(logits_nchw, targets_nhw):
    """Pure-JAX replica of the PyTorch DiceLoss forward."""
    _, c, _, _ = logits_nchw.shape
    probs = jax.nn.softmax(logits_nchw.astype(jnp.float32), axis=1)
    onehot = jax.nn.one_hot(targets_nhw, c, axis=1, dtype=jnp.float32)
    smooth = 1e-5
    inter = jnp.sum(probs * onehot, axis=(0, 2, 3))
    union = jnp.sum(probs, axis=(0, 2, 3)) + jnp.sum(onehot, axis=(0, 2, 3))
    dice = 1.0 - (2.0 * inter + smooth) / (union + smooth)
    return jnp.mean(dice)


if __name__ == "__main__":
    key = jax.random.PRNGKey(0)
    k1, k2 = jax.random.split(key)
    # H*W deliberately not a multiple of 128 so the ragged-tail handling is exercised.
    N, C, H, W = 2, 4, 16, 18
    logits = jax.random.normal(k1, (N, C, H, W), dtype=jnp.float32)
    targets = jax.random.randint(k2, (N, H, W), 0, C, dtype=jnp.int32)

    ref = jax.block_until_ready(_reference_dice(logits, targets))

    # Default path: single full-extent pixel block per batch (no masking).
    out = jax.block_until_ready(dice_loss(logits, targets))
    assert jnp.allclose(out, ref, atol=1e-4, rtol=1e-4), (out, ref)

    # Small-tile path: multiple blocks + 2-way pixel split + ragged/clamped tiles.
    out_tiled = jax.block_until_ready(dice_loss(logits, targets, max_tile=128))
    assert jnp.allclose(out_tiled, ref, atol=1e-4, rtol=1e-4), (out_tiled, ref)

    print("KERNEL_OK")
</pallas_src>

<mosaic_0001>
module attributes {stable_mosaic.version = 11 : i64} {
  func.func private @main(%arg0: i32) attributes {dimension_semantics = [#tpu.dimension_semantics<core_parallel>], iteration_bounds = array<i64: 2>, tpu.core_type = #tpu.core_type<sc_scalar_subcore>, window_params = []} {
    return
  }
}

module attributes {stable_mosaic.version = 11 : i64} {
  func.func private @main(%arg0: i32) attributes {dimension_semantics = [#tpu.dimension_semantics<core_parallel>], iteration_bounds = array<i64: 2>, tpu.core_type = #tpu.core_type<sc_scalar_subcore>, window_params = []} {
    return
  }
}

module attributes {stable_mosaic.version = 11 : i64} {
  func.func @kernel(%arg0: i32, %arg1: i32, %arg2: i32, %arg3: memref<1x4x288xf32, #tpu.memory_space<vmem>>, %arg4: memref<1x1x288xi32, #tpu.memory_space<vmem>>, %arg5: memref<1x1x4x1xf32, #tpu.memory_space<vmem>>, %arg6: memref<1x1x4x1xf32, #tpu.memory_space<vmem>>, %arg7: memref<4x288xf32, #tpu.memory_space<vmem>>, %arg8: memref<4x288xf32, #tpu.memory_space<vmem>>) attributes {dimension_semantics = [#tpu.dimension_semantics<parallel>, #tpu.dimension_semantics<parallel>, #tpu.dimension_semantics<arbitrary>], iteration_bounds = array<i64: 1, 2, 1>, scalar_prefetch = 0 : i64, scratch_operands = 2 : i64, tpu.core_type = #tpu.core_type<tc>, window_params = [{transform_indices = @transform_0, window_bounds = array<i64: 1, 4, 288>}, {transform_indices = @transform_1, window_bounds = array<i64: 1, 1, 288>}, {transform_indices = @transform_2, window_bounds = array<i64: 1, 1, 4, 1>}, {transform_indices = @transform_3, window_bounds = array<i64: 1, 1, 4, 1>}]} {
    %c0_i32 = arith.constant 0 : i32
    %0 = arith.cmpi eq, %arg2, %c0_i32 : i32
    %1 = arith.extui %0 : i1 to i32
    %c0_i32_0 = arith.constant 0 : i32
    %2 = arith.cmpi ne, %1, %c0_i32_0 : i32
    scf.if %2 {
      %cst_19 = arith.constant 0.000000e+00 : f32
      %36 = vector.broadcast %cst_19 : f32 to vector<4x288xf32>
      %c0_20 = arith.constant 0 : index
      %c0_21 = arith.constant 0 : index
      %37 = vector.load %arg7[%c0_20, %c0_21] : memref<4x288xf32, #tpu.memory_space<vmem>>, vector<4x288xf32>
      tpu.vector_store %arg7[%c0_20, %c0_21], %36 {strides = array<i32>} : memref<4x288xf32, #tpu.memory_space<vmem>>, vector<4x288xf32>,
      %cst_22 = arith.constant 0.000000e+00 : f32
      %38 = vector.broadcast %cst_22 : f32 to vector<4x288xf32>
      %c0_23 = arith.constant 0 : index
      %c0_24 = arith.constant 0 : index
      %39 = vector.load %arg8[%c0_23, %c0_24] : memref<4x288xf32, #tpu.memory_space<vmem>>, vector<4x288xf32>
      tpu.vector_store %arg8[%c0_23, %c0_24], %38 {strides = array<i32>} : memref<4x288xf32, #tpu.memory_space<vmem>>, vector<4x288xf32>,
    } else {
    }
    %c0 = arith.constant 0 : index
    %c0_1 = arith.constant 0 : index
    %c0_2 = arith.constant 0 : index
    %3 = vector.load %arg3[%c0, %c0_1, %c0_2] : memref<1x4x288xf32, #tpu.memory_space<vmem>>, vector<1x4x288xf32>
    %4 = vector.shape_cast %3 : vector<1x4x288xf32> to vector<4x288xf32>
    %c0_3 = arith.constant 0 : index
    %c0_4 = arith.constant 0 : index
    %c0_5 = arith.constant 0 : index
    %5 = vector.load %arg4[%c0_3, %c0_4, %c0_5] : memref<1x1x288xi32, #tpu.memory_space<vmem>>, vector<1x1x288xi32>
    %6 = vector.shape_cast %5 : vector<1x1x288xi32> to vector<1x288xi32>
    %cst = arith.constant dense<0xFF800000> : vector<288xf32>
    %7 = vector.multi_reduction <maximumf>, %4, %cst [0] : vector<4x288xf32> to vector<288xf32>
    %8 = vector.shape_cast %7 : vector<288xf32> to vector<1x288xf32>
    %9 = vector.broadcast %8 : vector<1x288xf32> to vector<4x288xf32>
    %10 = arith.subf %4, %9 : vector<4x288xf32>
    %11 = math.exp %10 : vector<4x288xf32>
    %cst_6 = arith.constant dense<0.000000e+00> : vector<288xf32>
    %12 = vector.multi_reduction <add>, %11, %cst_6 [0] : vector<4x288xf32> to vector<288xf32>
    %13 = vector.shape_cast %12 : vector<288xf32> to vector<1x288xf32>
    %14 = tpu.reciprocal %13 {approx = true} : vector<1x288xf32> -> vector<1x288xf32>
    %15 = arith.mulf %13, %14 : vector<1x288xf32>
    %cst_7 = arith.constant 2.000000e+00 : f32
    %16 = vector.broadcast %cst_7 : f32 to vector<1x288xf32>
    %17 = arith.subf %16, %15 : vector<1x288xf32>
    %18 = arith.mulf %14, %17 : vector<1x288xf32>
    %19 = vector.broadcast %18 : vector<1x288xf32> to vector<4x288xf32>
    %20 = arith.mulf %11, %19 : vector<4x288xf32>
    %21 = tpu.iota {dimensions = array<i32: 0>} : vector<4x1xi32>
    %22 = vector.broadcast %21 : vector<4x1xi32> to vector<4x288xi32>
    %23 = vector.broadcast %6 : vector<1x288xi32> to vector<4x288xi32>
    %24 = arith.cmpi eq, %22, %23 : vector<4x288xi32>
    %c0_8 = arith.constant 0 : index
    %c0_9 = arith.constant 0 : index
    %25 = vector.load %arg7[%c0_8, %c0_9] : memref<4x288xf32, #tpu.memory_space<vmem>>, vector<4x288xf32>
    %cst_10 = arith.constant 0.000000e+00 : f32
    %26 = vector.broadcast %cst_10 : f32 to vector<4x288xf32>
    %27 = arith.select %24, %20, %26 : vector<4x288xi1>, vector<4x288xf32>
    %28 = arith.addf %25, %27 : vector<4x288xf32>
    %c0_11 = arith.constant 0 : index
    %c0_12 = arith.constant 0 : index
    %29 = vector.load %arg7[%c0_11, %c0_12] : memref<4x288xf32, #tpu.memory_space<vmem>>, vector<4x288xf32>
    tpu.vector_store %arg7[%c0_11, %c0_12], %28 {strides = array<i32>} : memref<4x288xf32, #tpu.memory_space<vmem>>, vector<4x288xf32>,
    %c0_13 = arith.constant 0 : index
    %c0_14 = arith.constant 0 : index
    %30 = vector.load %arg8[%c0_13, %c0_14] : memref<4x288xf32, #tpu.memory_space<vmem>>, vector<4x288xf32>
    %31 = arith.addf %30, %20 : vector<4x288xf32>
    %c0_15 = arith.constant 0 : index
    %c0_16 = arith.constant 0 : index
    %32 = vector.load %arg8[%c0_15, %c0_16] : memref<4x288xf32, #tpu.memory_space<vmem>>, vector<4x288xf32>
    tpu.vector_store %arg8[%c0_15, %c0_16], %31 {strides = array<i32>} : memref<4x288xf32, #tpu.memory_space<vmem>>, vector<4x288xf32>,
    %c0_i32_17 = arith.constant 0 : i32
    %33 = arith.cmpi eq, %arg2, %c0_i32_17 : i32
    %34 = arith.extui %33 : i1 to i32
    %c0_i32_18 = arith.constant 0 : i32
    %35 = arith.cmpi ne, %34, %c0_i32_18 : i32
    scf.if %35 {
      %c0_19 = arith.constant 0 : index
      %c0_20 = arith.constant 0 : index
      %36 = vector.load %arg7[%c0_19, %c0_20] : memref<4x288xf32, #tpu.memory_space<vmem>>, vector<4x288xf32>
      %cst_21 = arith.constant dense<0.000000e+00> : vector<4xf32>
      %37 = vector.multi_reduction <add>, %36, %cst_21 [1] : vector<4x288xf32> to vector<4xf32>
      %38 = vector.shape_cast %37 : vector<4xf32> to vector<4x1xf32>
      %39 = vector.shape_cast %38 : vector<4x1xf32> to vector<1x1x4x1xf32>
      %c0_22 = arith.constant 0 : index
      %c0_23 = arith.constant 0 : index
      %c0_24 = arith.constant 0 : index
      %c0_25 = arith.constant 0 : index
      %40 = vector.load %arg5[%c0_22, %c0_23, %c0_24, %c0_25] : memref<1x1x4x1xf32, #tpu.memory_space<vmem>>, vector<1x1x4x1xf32>
      tpu.vector_store %arg5[%c0_22, %c0_23, %c0_24, %c0_25], %39 {strides = array<i32>} : memref<1x1x4x1xf32, #tpu.memory_space<vmem>>, vector<1x1x4x1xf32>,
      %c0_26 = arith.constant 0 : index
      %c0_27 = arith.constant 0 : index
      %41 = vector.load %arg8[%c0_26, %c0_27] : memref<4x288xf32, #tpu.memory_space<vmem>>, vector<4x288xf32>
      %cst_28 = arith.constant dense<0.000000e+00> : vector<4xf32>
      %42 = vector.multi_reduction <add>, %41, %cst_28 [1] : vector<4x288xf32> to vector<4xf32>
      %43 = vector.shape_cast %42 : vector<4xf32> to vector<4x1xf32>
      %44 = vector.shape_cast %43 : vector<4x1xf32> to vector<1x1x4x1xf32>
      %c0_29 = arith.constant 0 : index
      %c0_30 = arith.constant 0 : index
      %c0_31 = arith.constant 0 : index
      %c0_32 = arith.constant 0 : index
      %45 = vector.load %arg6[%c0_29, %c0_30, %c0_31, %c0_32] : memref<1x1x4x1xf32, #tpu.memory_space<vmem>>, vector<1x1x4x1xf32>
      tpu.vector_store %arg6[%c0_29, %c0_30, %c0_31, %c0_32], %44 {strides = array<i32>} : memref<1x1x4x1xf32, #tpu.memory_space<vmem>>, vector<1x1x4x1xf32>,
    } else {
    }
    return
  }
  func.func @transform_0(%arg0: i32, %arg1: i32, %arg2: i32) -> (i32, i32, i32) {
    %c1_i32 = arith.constant 1 : i32
    %0 = arith.muli %arg0, %c1_i32 : i32
    %1 = arith.addi %0, %arg2 : i32
    %c0_i32 = arith.constant 0 : i32
    %2 = arith.minsi %1, %c0_i32 : i32
    %c0_i32_0 = arith.constant 0 : i32
    %c0_i32_1 = arith.constant 0 : i32
    return %arg1, %c0_i32_0, %2 : i32, i32, i32
  }
  func.func @transform_1(%arg0: i32, %arg1: i32, %arg2: i32) -> (i32, i32, i32) {
    %c1_i32 = arith.constant 1 : i32
    %0 = arith.muli %arg0, %c1_i32 : i32
    %1 = arith.addi %0, %arg2 : i32
    %c0_i32 = arith.constant 0 : i32
    %2 = arith.minsi %1, %c0_i32 : i32
    %c0_i32_0 = arith.constant 0 : i32
    %c0_i32_1 = arith.constant 0 : i32
    return %arg1, %c0_i32_0, %2 : i32, i32, i32
  }
  func.func @transform_2(%arg0: i32, %arg1: i32, %arg2: i32) -> (i32, i32, i32, i32) {
    %c0_i32 = arith.constant 0 : i32
    %c0_i32_0 = arith.constant 0 : i32
    %c0_i32_1 = arith.constant 0 : i32
    return %arg0, %arg1, %c0_i32, %c0_i32_0 : i32, i32, i32, i32
  }
  func.func @transform_3(%arg0: i32, %arg1: i32, %arg2: i32) -> (i32, i32, i32, i32) {
    %c0_i32 = arith.constant 0 : i32
    %c0_i32_0 = arith.constant 0 : i32
    %c0_i32_1 = arith.constant 0 : i32
    return %arg0, %arg1, %c0_i32, %c0_i32_0 : i32, i32, i32, i32
  }
}

</mosaic_0001>

<bundles_post_ra>
// kernel: dice_loss.1
= control target key start
LH: loop header
LB: loop body
LE: loop exit
PB: predicated region body
PF: predicated region fallthrough
CT: control target
= control target key end

     0   :  { %s711_s12 = smov 0   ;;  %s713_s13 = smov 0   ;;  %s771_s0 = inlined_call_operand.vmem [shape: f32[2,4,288], index: 0, kind: input, shape index: {}]   ;;  %s772_s1 = inlined_call_operand.vmem [shape: s32[2,1,288], index: 1, kind: input, shape index: {}]   ;;  %s773_s2 = inlined_call_operand.vmem [shape: f32[1,2,4,1], index: 2, kind: output, shape index: {0}]   ;;  %s774_s3 = inlined_call_operand.vmem [shape: f32[1,2,4,1], index: 3, kind: output, shape index: {1}]  }
   0x1   :  { %s715_s14 = smov 0  }
   0x2 LB: > { %s29_s15 = sadd.s32 1, %s684_s13  ;;  %p621_p0 = scmp.ge.s32.totalorder %s688_s14, 1  ;;  %s688_s14 = sphi %s715_s14, %s14_s14   ;;  %s684_s13 = sphi %s713_s13, %s776_s13   ;;  %s680_s12 = sphi %s711_s12, %s775_s12  }
   0x3   : > { %p31_p1 = scmp.ge.s32.totalorder %s29_s15, 2  ;;  %p210_p2 = scmp.lt.s32.totalorder %s688_s14, 3 }
   0x5   : > { %s778_s15 = smov (%p31_p1, %s29_s15), 0  ;;  %p211_p3 = pnand %p621_p0, %p210_p2 }
   0x6   : > { %p267_p4 = scmp.lt.s32.totalorder (!%p211_p3), %s680_s12, 1  ;;  %vm315_vm0 = vcmask (!%p211_p3), 257024   ;;  %v690_v0 = vmov (!%p211_p3), 0.0   ;;  %vm325_vm1 = vcmask (!%p211_p3), 1043456   ;;  %v400_v51 = vlaneseq (!%p211_p3) }
   0x7   : > { %214 = sbr.rel (%p211_p3) target bundleno = 244 (0xf4), region = 28  ;;  %316 = vst.msk [vmem:[#allocation2 + $0x8] sm:$0xf] (!%p211_p3), %vm315_vm0, %v690_v0  ;;  %318 = vst.msk [vmem:[#allocation3 + $0x8] sm:$0xf] (!%p211_p3), %vm315_vm0, %v690_v0  ;;  %vm454_vm5 = vcmask (!%p211_p3), 3072  }
   0x8   : > { %v401_v55 = vshrl.u32 (!%p211_p3), %v400_v51, 7 }
   0xa   : > { %v412_v56 = vsub.s32 (!%p211_p3), 2, %v401_v55 }
   0xe   : > { %s780_s12 = smov (!%p267_p4, %s680_s12), 1 }
   0xf   : > { %s627_s16 = smul.u32 12, %s780_s12  ;;  %s623_s24 = sshll.u32 %s780_s12, 2 }
  0x10   : > { %s628_s20 = smul.u32 3, %s780_s12  ;;  %s301_s27 = scalar_lea.vmem %s773_s2, %s623_s24 }
  0x11   : > { %s274_s19 = scalar_lea.vmem %s771_s0, %s627_s16  ;;  %s309_s30 = scalar_lea.vmem %s774_s3, %s623_s24 }
  0x12   : > { %v319_v1 = vld [vmem:[%s274_s19] sm:$0xff]  ;;  %v320_v2 = vld [vmem:[%s274_s19 + $0x8] sm:$0xf]  ;;  %s289_s23 = scalar_lea.vmem %s772_s1, %s628_s20 }
  0x13   : > { %v323_v3 = vcombine.high %v319_v1, %v319_v1  ;;  %v326_v4 = vsel %vm325_vm1, %v319_v1, -inf  ;;  %v341_v5 = vsel %vm315_vm0, %v320_v2, -inf  ;;  %v321_v57 = vld [vmem:[%s289_s23] sm:$0x7] }
  0x14   : > { %v327_v6 = vrot.slane %v326_v4, 4  ;;  %v342_v7 = vrot.slane %v341_v5, 4  ;;  %v413_v60 = vrot.slane %v321_v57, %v412_v56 }
  0x15   : > { %v333_v8 = vsel %vm325_vm1, %v323_v3, -inf  ;;  %v434_v3 = vld [vmem:[#allocation3 + $0x8] sm:$0xf] }
  0x16   : > { %v328_v9 = vmax.f32 %v326_v4, %v327_v6  ;;  %v334_v10 = vrot.slane %v333_v8, 4  ;;  %v343_v11 = vmax.f32 %v341_v5, %v342_v7  ;;  %vm416_vm2 = vcmp.eq.s32.totalorder %v401_v55, %v413_v60  ;;  %v418_v7 = vld [vmem:[#allocation2 + $0x8] sm:$0xf] }
  0x18   : > { %v329_v12 = vrot.slane %v328_v9, 2  ;;  %v335_v13 = vmax.f32 %v333_v8, %v334_v10  ;;  %v344_v14 = vrot.slane %v343_v11, 2  ;;  %v408_v8 = vsub.s32 1, %v401_v55 }
  0x1a   : > { %v330_v15 = vmax.f32 %v328_v9, %v329_v12  ;;  %v336_v16 = vrot.slane %v335_v13, 2  ;;  %v345_v17 = vmax.f32 %v343_v11, %v344_v14 }
  0x1c   : > { %v331_v18 = vrot.slane %v330_v15, 1  ;;  %v337_v19 = vmax.f32 %v335_v13, %v336_v16  ;;  %v346_v20 = vrot.slane %v345_v17, 1  ;;  %v409_v16 = vrot.slane %v321_v57, %v408_v8 }
  0x1e   : > { %v332_v21 = vmax.f32 %v330_v15, %v331_v18  ;;  %v338_v22 = vrot.slane %v337_v19, 1  ;;  %v347_v23 = vmax.f32 %v345_v17, %v346_v20  ;;  %vm415_vm4 = vcmp.eq.s32.totalorder %v401_v55, %v409_v16 }
  0x20   : > { %v339_v24 = vmax.f32 %v337_v19, %v338_v22  ;;  %v353_v25 = vsub.f32 %v320_v2, %v347_v23  ;;  %v404_v2 = vsub.s32 0, %v401_v55 }
  0x22   : > { %v350_v26 = vcombine.low %v332_v21, %v339_v24  ;;  %v356_v27 = vmul.f32 1.442695, %v353_v25  ;;  %v405_v13 = vrot.slane %v321_v57, %v404_v2 }
  0x24   : > { %v352_v28 = vsub.f32 %v319_v1, %v350_v26  ;;  %655 = vpow2.f32 %v356_v27  ;;  %vm414_vm3 = vcmp.eq.s32.totalorder %v401_v55, %v405_v13 }
  0x26   : > { %v354_v29 = vmul.f32 1.442695, %v352_v28 }
  0x28   : > { %657 = vpow2.f32 %v354_v29 }
  0x2e   : > { %v656_v30 = vpop.eup %655 }
  0x2f   : > { %v375_v31 = vsel %vm315_vm0, %v656_v30, 0.0 }
  0x30   : > { %v376_v32 = vrot.slane %v375_v31, 4 }
  0x32   : > { %v658_v33 = vpop.eup %657  ;;  %v377_v34 = vadd.f32 %v376_v32, %v375_v31 }
  0x33   : > { %v359_v35 = vcombine.high %v658_v33, %v658_v33  ;;  %v361_v36 = vsel %vm325_vm1, %v658_v33, 0.0 }
  0x34   : > { %v362_v37 = vrot.slane %v361_v36, 4  ;;  %v378_v38 = vrot.slane %v377_v34, 2 }
  0x35   : > { %v368_v39 = vsel %vm325_vm1, %v359_v35, 0.0 }
  0x36   : > { %v363_v40 = vadd.f32 %v362_v37, %v361_v36  ;;  %v369_v41 = vrot.slane %v368_v39, 4  ;;  %v379_v42 = vadd.f32 %v378_v38, %v377_v34 }
  0x38   : > { %v364_v43 = vrot.slane %v363_v40, 2  ;;  %v370_v44 = vadd.f32 %v369_v41, %v368_v39  ;;  %v380_v45 = vrot.slane %v379_v42, 1 }
  0x3a   : > { %v365_v46 = vadd.f32 %v364_v43, %v363_v40  ;;  %v371_v47 = vrot.slane %v370_v44, 2  ;;  %v381_v48 = vadd.f32 %v380_v45, %v379_v42 }
  0x3c   : > { %v366_v49 = vrot.slane %v365_v46, 1  ;;  %v372_v50 = vadd.f32 %v371_v47, %v370_v44  ;;  %659 = vrcp.f32 %v381_v48 }
  0x3e   : > { %v367_v52 = vadd.f32 %v366_v49, %v365_v46  ;;  %v373_v53 = vrot.slane %v372_v50, 1 }
  0x40   : > { %v374_v54 = vadd.f32 %v373_v53, %v372_v50  ;;  %661 = vrcp.f32 %v367_v52 }
  0x42   : > { %663 = vrcp.f32 %v374_v54 }
  0x46   : > { %v660_v58 = vpop.eup %659 }
  0x47   : > { %v387_v59 = vmul.f32 %v660_v58, %v381_v48 }
  0x49   : > { %v390_v61 = vsub.f32 2.0, %v387_v59 }
  0x4a   : > { %v662_v62 = vpop.eup %661 }
  0x4b   : > { %v385_v63 = vmul.f32 %v662_v62, %v367_v52  ;;  %v393_v0 = vmul.f32 %v660_v58, %v390_v61 }
  0x4c   : > { %v664_v1 = vpop.eup %663 }
  0x4d   : > { %v386_v4 = vmul.f32 %v664_v1, %v374_v54  ;;  %v388_v5 = vsub.f32 2.0, %v385_v63  ;;  %v399_v6 = vmul.f32 %v656_v30, %v393_v0 }
  0x4f   : > { %v389_v9 = vsub.f32 2.0, %v386_v4  ;;  %v391_v10 = vmul.f32 %v662_v62, %v388_v5  ;;  %v424_v11 = vsel %vm416_vm2, %v399_v6, 0.0  ;;  %v436_v12 = vadd.f32 %v434_v3, %v399_v6 }
  0x50   : > { %v430_v14 = vadd.f32 %v424_v11, %v418_v7 }
  0x51   : > { %v392_v15 = vmul.f32 %v664_v1, %v389_v9  ;;  %438 = vst.msk [vmem:[#allocation3 + $0x8] sm:$0xf] %vm315_vm0, %v436_v12 }
  0x52   : > { %432 = vst.msk [vmem:[#allocation2 + $0x8] sm:$0xf] %vm315_vm0, %v430_v14 }
  0x53   : > { %v396_v17 = vcombine.low %v391_v10, %v392_v15 }
  0x55   : > { %v398_v18 = vmul.f32 %v658_v33, %v396_v17 }
  0x57   : > { %v420_v19 = vcombine.high %v398_v18, %v398_v18  ;;  %v422_v20 = vsel %vm414_vm3, %v398_v18, 0.0  ;;  %v461_v26 = vsel %vm325_vm1, %v398_v18, 0.0 }
  0x58   : > { %v457_v28 = vld [vmem:[#allocation3 + $0x8] sm:$0xf] }
  0x59   : > { %v423_v21 = vsel %vm415_vm4, %v420_v19, 0.0  ;;  %v443_v23 = vld [vmem:[#allocation2 + $0x8] sm:$0xf]  ;;  %v462_v27 = vsel %vm325_vm1, %v420_v19, 0.0  ;;  %v464_v33 = vsel %vm315_vm0, %v457_v28, 0.0 }
  0x5a   : > { %v427_v22 = vcombine.low %v422_v20, %v423_v21  ;;  %v665_v24 = vcombine.low %v423_v21, %v423_v21  ;;  %v450_v30 = vsel %vm315_vm0, %v443_v23, 0.0  ;;  %v463_v32 = vadd.f32 %v462_v27, %v461_v26 }
  0x5c   : > { %v447_v25 = vsel %vm325_vm1, %v427_v22, 0.0  ;;  %v448_v29 = vsel %vm325_vm1, %v665_v24, 0.0  ;;  %v465_v35 = vadd.f32 %v464_v33, %v463_v32 }
  0x5d   : > { %v449_v31 = vadd.f32 %v448_v29, %v447_v25 }
  0x5f   : > { %v451_v34 = vadd.f32 %v450_v30, %v449_v31 }
  0x61   : > { %452 = vadd.xlane.f32.xlu0 %v451_v34 }
  0x65   : > { %466 = vadd.xlane.f32.xlu0 %v465_v35 }
  0xee   : > { %v453_v36 = vpop.xlane.xlu0 %452 }
  0xef   : > { %455 = vst.msk [vmem:[%s301_s27] sm:$0xf] %vm454_vm5, %v453_v36 }
  0xf2   : > { %v467_v37 = vpop.xlane.xlu0 %466 }
  0xf3   : > { %468 = vst.msk [vmem:[%s309_s30] sm:$0xf] %vm454_vm5, %v467_v37 }
  0xf4 PF: > { %s14_s14 = sadd.s32 1, %s688_s14   ;;  %s775_s12 = smov %s684_s13 }
  0xf5   : > { %p11_p5 = scmp.ge.s32.totalorder %s14_s14, 4   ;;  %s776_s13 = smov %s778_s15 }
  0xf7   :  { %13 = sbr.rel (!%p11_p5) target bundleno = 2 (0x2), region = 81 }

</bundles_post_ra>
